<compile_context>
chip_gen: v6e
topology: v6e:2x2x1
jax: 0.10.0
libtpu: 0.0.40
codegen_flags: <defaults>
</compile_context>

<pallas_src>
import jax
import jax.numpy as jnp
from jax.experimental import pallas as pl
from jax.experimental.pallas import tpu as pltpu


def _mlp_kernel(x_ref, w1_ref, b1_ref, w2_ref, b2_ref, w3_ref, b3_ref, o_ref):
    # Layer 1: (TB, dim)bf16 @ (dim, H1)bf16 -> f32 accumulate; bias + ReLU in f32.
    h1 = jnp.dot(x_ref[...], w1_ref[...], preferred_element_type=jnp.float32)
    h1 = jnp.maximum(h1 + b1_ref[...], 0.0)
    # Layer 2: cast activations to bf16 for the MXU, accumulate in f32.
    h2 = jnp.dot(h1.astype(jnp.bfloat16), w2_ref[...],
                 preferred_element_type=jnp.float32)
    h2 = jnp.maximum(h2 + b2_ref[...], 0.0)
    # Layer 3: w3 replicated to (8, H2); contract against h2^T so the per-row scalar lands
    # lane-major: (8, H2) @ (H2, TB) -> (8, TB). No N=1 column-sparse result, no masked
    # stores — the final store below is a dense 128-lane vst.
    out = jnp.dot(w3_ref[...], h2.T, preferred_element_type=jnp.float32)
    o_ref[...] = (out + b3_ref[...]).astype(o_ref.dtype)


def reward_approximator_forward(x, params, *, tb=512):
    """x: [B, dim] float32 -> [B, 1] float32 (same forward semantics as the torch module).

    params: w1 [dim,H1], b1 [1,H1], w2 [H1,H2], b2 [1,H2], w3 [H2,1], b3 [1,1] in float32;
    weights are stored [in, out] (transposed vs torch), so each layer is y = x @ W + b.
    """
    w1, b1, w2, b2, w3, b3 = (params["w1"], params["b1"], params["w2"],
                              params["b2"], params["w3"], params["b3"])
    B, dim = x.shape
    h1_dim, h2_dim = w1.shape[1], w2.shape[1]

    grid = pl.cdiv(B, tb)
    b_pad = grid * tb

    # bf16 matmul operands: halves x traffic into the MXU and doubles MXU rate on v6e/v7x.
    # All accumulation / elementwise math stays f32 inside the kernel (safe on v5e too).
    x_b = x.astype(jnp.bfloat16)
    if b_pad != B:
        x_b = jnp.pad(x_b, ((0, b_pad - B), (0, 0)))
    w1_b = w1.astype(jnp.bfloat16)
    w2_b = w2.astype(jnp.bfloat16)
    # Final-layer weight as an (8, H2) row-replicated f32 block (8 = f32 sublane count).
    w3_r = jnp.broadcast_to(w3.reshape(1, h2_dim), (8, h2_dim)).astype(jnp.float32)

    cost = pl.CostEstimate(
        flops=2 * b_pad * (dim * h1_dim + h1_dim * h2_dim + 8 * h2_dim),
        transcendentals=0,
        bytes_accessed=(b_pad * dim * 2                          # x (bf16)
                        + (dim * h1_dim + h1_dim * h2_dim) * 2   # w1, w2 (bf16)
                        + (h1_dim + h2_dim + 1 + 8 * h2_dim) * 4  # biases + w3
                        + 8 * b_pad * 4),                        # output
    )

    out = pl.pallas_call(
        _mlp_kernel,
        out_shape=jax.ShapeDtypeStruct((8, b_pad), jnp.float32),
        grid=(grid,),
        in_specs=[
            pl.BlockSpec((tb, dim), lambda i: (i, 0)),         # x: streamed per batch tile
            pl.BlockSpec((dim, h1_dim), lambda i: (0, 0)),     # weights/biases: VMEM-resident
            pl.BlockSpec((1, h1_dim), lambda i: (0, 0)),
            pl.BlockSpec((h1_dim, h2_dim), lambda i: (0, 0)),
            pl.BlockSpec((1, h2_dim), lambda i: (0, 0)),
            pl.BlockSpec((8, h2_dim), lambda i: (0, 0)),
            pl.BlockSpec((1, 1), lambda i: (0, 0)),
        ],
        out_specs=pl.BlockSpec((8, tb), lambda i: (0, i)),     # lane-dense output tile
        compiler_params=pltpu.CompilerParams(
            dimension_semantics=("parallel",),   # split the batch grid across TCs on v7x
            vmem_limit_bytes=32 * 1024 * 1024,   # safe on v5e/v6e/v7x; actual usage ~100 KiB
        ),
        cost_estimate=cost,
    )(x_b, w1_b, b1, w2_b, b2, w3_r, b3)

    return out[0, :B].reshape(B, 1)


def init_params(key, dim, hidden_dims=(32, 32)):
    """Deterministic init mimicking torch.nn.Linear default (uniform +-1/sqrt(fan_in))."""
    sizes = [dim] + list(hidden_dims) + [1]
    params = {}
    for i in range(len(sizes) - 1):
        fan_in, fan_out = sizes[i], sizes[i + 1]
        key, kw, kb = jax.random.split(key, 3)
        bound = 1.0 / jnp.sqrt(fan_in)
        # stored as [in, out] (transposed vs torch's [out, in])
        params[f"w{i + 1}"] = jax.random.uniform(
            kw, (fan_in, fan_out), jnp.float32, -bound, bound)
        params[f"b{i + 1}"] = jax.random.uniform(
            kb, (1, fan_out), jnp.float32, -bound, bound)
    return params


def reference_forward(x, params):
    """Plain-JAX reference mirroring the kernel's numerics (bf16 matmul operands, f32 acc)."""
    h = jnp.dot(x.astype(jnp.bfloat16), params["w1"].astype(jnp.bfloat16),
                preferred_element_type=jnp.float32)
    h = jnp.maximum(h + params["b1"], 0.0)
    h = jnp.dot(h.astype(jnp.bfloat16), params["w2"].astype(jnp.bfloat16),
                preferred_element_type=jnp.float32)
    h = jnp.maximum(h + params["b2"], 0.0)
    return jnp.dot(h, params["w3"], preferred_element_type=jnp.float32) + params["b3"]


if __name__ == "__main__":
    key = jax.random.PRNGKey(0)
    k_param, k_x1, k_x2 = jax.random.split(key, 3)

    dim = 16
    params = init_params(k_param, dim, hidden_dims=(32, 32))
    fwd = jax.jit(reward_approximator_forward, static_argnames=("tb",))

    # Small, module-native batch (single grid step after padding to TB).
    x_small = jax.random.normal(k_x1, (8, dim), dtype=jnp.float32)
    out_small = jax.block_until_ready(fwd(x_small, params))
    ref_small = reference_forward(x_small, params)
    assert out_small.shape == (8, 1)
    assert jnp.allclose(out_small, ref_small, atol=1e-4, rtol=1e-4)

    # Larger ragged batch: exercises multi-tile grid, padding, and VMEM-resident weights.
    x_big = jax.random.normal(k_x2, (1100, dim), dtype=jnp.float32)
    out_big = jax.block_until_ready(fwd(x_big, params))
    ref_big = reference_forward(x_big, params)
    assert out_big.shape == (1100, 1)
    assert jnp.allclose(out_big, ref_big, atol=1e-4, rtol=1e-4)

    print("KERNEL_OK")
</pallas_src>

<mosaic_0001>
module attributes {stable_mosaic.version = 11 : i64} {
  func.func @_mlp_kernel(%arg0: i32, %arg1: memref<512x16xbf16, #tpu.memory_space<vmem>>, %arg2: memref<16x32xbf16, #tpu.memory_space<vmem>>, %arg3: memref<1x32xf32, #tpu.memory_space<vmem>>, %arg4: memref<32x32xbf16, #tpu.memory_space<vmem>>, %arg5: memref<1x32xf32, #tpu.memory_space<vmem>>, %arg6: memref<8x32xf32, #tpu.memory_space<vmem>>, %arg7: memref<1x1xf32, #tpu.memory_space<vmem>>, %arg8: memref<8x512xf32, #tpu.memory_space<vmem>>) attributes {dimension_semantics = [#tpu.dimension_semantics<parallel>], iteration_bounds = array<i64: 1>, scalar_prefetch = 0 : i64, scratch_operands = 0 : i64, tpu.core_type = #tpu.core_type<tc>, window_params = [{transform_indices = @transform_0, window_bounds = array<i64: 512, 16>}, {pipeline_mode = #tpu.pipeline_mode<synchronous>, transform_indices = @transform_1, window_bounds = array<i64: 16, 32>}, {pipeline_mode = #tpu.pipeline_mode<synchronous>, transform_indices = @transform_2, window_bounds = array<i64: 1, 32>}, {pipeline_mode = #tpu.pipeline_mode<synchronous>, transform_indices = @transform_3, window_bounds = array<i64: 32, 32>}, {pipeline_mode = #tpu.pipeline_mode<synchronous>, transform_indices = @transform_4, window_bounds = array<i64: 1, 32>}, {pipeline_mode = #tpu.pipeline_mode<synchronous>, transform_indices = @transform_5, window_bounds = array<i64: 8, 32>}, {pipeline_mode = #tpu.pipeline_mode<synchronous>, transform_indices = @transform_6, window_bounds = array<i64: 1, 1>}, {transform_indices = @transform_7, window_bounds = array<i64: 8, 512>}]} {
    %c0 = arith.constant 0 : index
    %c0_0 = arith.constant 0 : index
    %0 = vector.load %arg1[%c0, %c0_0] : memref<512x16xbf16, #tpu.memory_space<vmem>>, vector<512x16xbf16>
    %c0_1 = arith.constant 0 : index
    %c0_2 = arith.constant 0 : index
    %1 = vector.load %arg2[%c0_1, %c0_2] : memref<16x32xbf16, #tpu.memory_space<vmem>>, vector<16x32xbf16>
    %cst = arith.constant dense<0.000000e+00> : vector<512x32xf32>
    %2 = tpu.matmul %0, %1, %cst {dimension_numbers = #tpu.dot_dimension_numbers<[1], [0], [0], [1], [0, 0, 1, 1], [], []>} : vector<512x16xbf16>, vector<16x32xbf16>, vector<512x32xf32> -> vector<512x32xf32>
    %c0_3 = arith.constant 0 : index
    %c0_4 = arith.constant 0 : index
    %3 = vector.load %arg3[%c0_3, %c0_4] : memref<1x32xf32, #tpu.memory_space<vmem>>, vector<1x32xf32>
    %4 = vector.broadcast %3 : vector<1x32xf32> to vector<512x32xf32>
    %5 = arith.addf %2, %4 : vector<512x32xf32>
    %cst_5 = arith.constant 0.000000e+00 : f32
    %6 = vector.broadcast %cst_5 : f32 to vector<512x32xf32>
    %7 = arith.maximumf %5, %6 : vector<512x32xf32>
    %8 = arith.truncf %7 : vector<512x32xf32> to vector<512x32xbf16>
    %c0_6 = arith.constant 0 : index
    %c0_7 = arith.constant 0 : index
    %9 = vector.load %arg4[%c0_6, %c0_7] : memref<32x32xbf16, #tpu.memory_space<vmem>>, vector<32x32xbf16>
    %cst_8 = arith.constant dense<0.000000e+00> : vector<512x32xf32>
    %10 = tpu.matmul %8, %9, %cst_8 {dimension_numbers = #tpu.dot_dimension_numbers<[1], [0], [0], [1], [0, 0, 1, 1], [], []>} : vector<512x32xbf16>, vector<32x32xbf16>, vector<512x32xf32> -> vector<512x32xf32>
    %c0_9 = arith.constant 0 : index
    %c0_10 = arith.constant 0 : index
    %11 = vector.load %arg5[%c0_9, %c0_10] : memref<1x32xf32, #tpu.memory_space<vmem>>, vector<1x32xf32>
    %12 = vector.broadcast %11 : vector<1x32xf32> to vector<512x32xf32>
    %13 = arith.addf %10, %12 : vector<512x32xf32>
    %cst_11 = arith.constant 0.000000e+00 : f32
    %14 = vector.broadcast %cst_11 : f32 to vector<512x32xf32>
    %15 = arith.maximumf %13, %14 : vector<512x32xf32>
    %c0_12 = arith.constant 0 : index
    %c0_13 = arith.constant 0 : index
    %16 = vector.load %arg6[%c0_12, %c0_13] : memref<8x32xf32, #tpu.memory_space<vmem>>, vector<8x32xf32>
    %17 = tpu.transpose %15, [1, 0] : vector<512x32xf32> -> vector<32x512xf32>
    %cst_14 = arith.constant dense<0.000000e+00> : vector<8x512xf32>
    %18 = tpu.matmul %16, %17, %cst_14 {dimension_numbers = #tpu.dot_dimension_numbers<[1], [0], [0], [1], [0, 0, 1, 1], [], []>} : vector<8x32xf32>, vector<32x512xf32>, vector<8x512xf32> -> vector<8x512xf32>
    %c0_15 = arith.constant 0 : index
    %c0_16 = arith.constant 0 : index
    %19 = vector.load %arg7[%c0_15, %c0_16] : memref<1x1xf32, #tpu.memory_space<vmem>>, vector<1x1xf32>
    %20 = vector.broadcast %19 : vector<1x1xf32> to vector<8x512xf32>
    %21 = arith.addf %18, %20 : vector<8x512xf32>
    %c0_17 = arith.constant 0 : index
    %c0_18 = arith.constant 0 : index
    %22 = vector.load %arg8[%c0_17, %c0_18] : memref<8x512xf32, #tpu.memory_space<vmem>>, vector<8x512xf32>
    tpu.vector_store %arg8[%c0_17, %c0_18], %21 {strides = array<i32>} : memref<8x512xf32, #tpu.memory_space<vmem>>, vector<8x512xf32>,
    return
  }
  func.func @transform_0(%arg0: i32) -> (i32, i32) {
    %c0_i32 = arith.constant 0 : i32
    %c0_i32_0 = arith.constant 0 : i32
    return %arg0, %c0_i32 : i32, i32
  }
  func.func @transform_1(%arg0: i32) -> (i32, i32) {
    %c0_i32 = arith.constant 0 : i32
    %c0_i32_0 = arith.constant 0 : i32
    %c0_i32_1 = arith.constant 0 : i32
    return %c0_i32, %c0_i32_0 : i32, i32
  }
  func.func @transform_2(%arg0: i32) -> (i32, i32) {
    %c0_i32 = arith.constant 0 : i32
    %c0_i32_0 = arith.constant 0 : i32
    %c0_i32_1 = arith.constant 0 : i32
    return %c0_i32, %c0_i32_0 : i32, i32
  }
  func.func @transform_3(%arg0: i32) -> (i32, i32) {
    %c0_i32 = arith.constant 0 : i32
    %c0_i32_0 = arith.constant 0 : i32
    %c0_i32_1 = arith.constant 0 : i32
    return %c0_i32, %c0_i32_0 : i32, i32
  }
  func.func @transform_4(%arg0: i32) -> (i32, i32) {
    %c0_i32 = arith.constant 0 : i32
    %c0_i32_0 = arith.constant 0 : i32
    %c0_i32_1 = arith.constant 0 : i32
    return %c0_i32, %c0_i32_0 : i32, i32
  }
  func.func @transform_5(%arg0: i32) -> (i32, i32) {
    %c0_i32 = arith.constant 0 : i32
    %c0_i32_0 = arith.constant 0 : i32
    %c0_i32_1 = arith.constant 0 : i32
    return %c0_i32, %c0_i32_0 : i32, i32
  }
  func.func @transform_6(%arg0: i32) -> (i32, i32) {
    %c0_i32 = arith.constant 0 : i32
    %c0_i32_0 = arith.constant 0 : i32
    %c0_i32_1 = arith.constant 0 : i32
    return %c0_i32, %c0_i32_0 : i32, i32
  }
  func.func @transform_7(%arg0: i32) -> (i32, i32) {
    %c0_i32 = arith.constant 0 : i32
    %c0_i32_0 = arith.constant 0 : i32
    return %c0_i32, %arg0 : i32, i32
  }
}

</mosaic_0001>

<bundles_post_ra>
// kernel: reward_approximator_forward.1
= control target key start
LH: loop header
LB: loop body
LE: loop exit
PB: predicated region body
PF: predicated region fallthrough
CT: control target
= control target key end

     0   :  { %vm268_vm0 = vcmask 130048   ;;  %vm773_vm1 = vcmask 261120   ;;  %s2625_s1 = inlined_call_operand.vmem [shape: bf16[16,32], index: 1, kind: input, shape index: {}]   ;;  %s2626_s0 = inlined_call_operand.vmem [shape: bf16[512,16], index: 0, kind: input, shape index: {}]   ;;  %s2627_s3 = inlined_call_operand.vmem [shape: bf16[32,32], index: 3, kind: input, shape index: {}]   ;;  %s2628_s2 = inlined_call_operand.vmem [shape: f32[1,32], index: 2, kind: input, shape index: {}]   ;;  %s2629_s4 = inlined_call_operand.vmem [shape: f32[1,32], index: 4, kind: input, shape index: {}]   ;;  %s2630_s5 = inlined_call_operand.vmem [shape: f32[8,32], index: 5, kind: input, shape index: {}]   ;;  %s2631_s6 = inlined_call_operand.<no memory space> [shape: f32[1,1], index: 6, kind: input, shape index: {}]   ;;  %s2632_s7 = inlined_call_operand.vmem [shape: f32[8,512], index: 7, kind: output, shape index: {}]  }
   0x1   :  { %v2018_v0 = vld [vmem:[%s2625_s1] sm:$0xff]   ;;  %v2020_v2 = vld [vmem:[%s2626_s0 + $0x8] sm:$0xff]   ;;  %v2021_v3 = vld [vmem:[%s2626_s0 + $0x10] sm:$0xff]  }
   0x2   :  { %v2019_v1 = vld [vmem:[%s2626_s0] sm:$0xff]   ;;  %1882 = vmatprep.subr.bf16.mxu0 %v2018_v0  ;;  %v2022_v4 = vld [vmem:[%s2626_s0 + $0x18] sm:$0xff]   ;;  %v2024_v6 = vld [vmem:[%s2626_s0 + $0x28] sm:$0xff]  }
   0x3   :  { %1883 = vmatpush3.bf16.msra.mxu0 %v2018_v0  ;;  %1884 = vmatprep.mubr.msk.bf16.mxu0 %vm268_vm0, %v2019_v1  ;;  %v2023_v5 = vld [vmem:[%s2626_s0 + $0x20] sm:$0xff]   ;;  %v2025_v7 = vld [vmem:[%s2626_s0 + $0x30] sm:$0xff]   ;;  %v2026_v8 = vld [vmem:[%s2626_s0 + $0x38] sm:$0xff]  }
   0x4   :  { %v2027_v9 = vld [vmem:[%s2626_s0 + $0x40] sm:$0xff]   ;;  %v2028_v10 = vld [vmem:[%s2626_s0 + $0x48] sm:$0xff]   ;;  %v2029_v11 = vld [vmem:[%s2626_s0 + $0x50] sm:$0xff]  }
   0x5   :  { %v2030_v12 = vld [vmem:[%s2626_s0 + $0x58] sm:$0xff]   ;;  %v2031_v13 = vld [vmem:[%s2626_s0 + $0x60] sm:$0xff]   ;;  %v2032_v14 = vld [vmem:[%s2626_s0 + $0x68] sm:$0xff]  }
   0x6   :  { %1885 = vmatmul.mubr.msk.bf16.vlgmr.msra.gmra.mxu0 %vm268_vm0, %v2020_v2  ;;  %v2033_v15 = vld [vmem:[%s2626_s0 + $0x70] sm:$0xff]   ;;  %v2034_v16 = vld [vmem:[%s2626_s0 + $0x78] sm:$0xff]   ;;  %v2035_v17 = vld [vmem:[%s2626_s0 + $0x80] sm:$0xff]  }
   0x7   :  { %1888 = vmatprep.mubr.msk.bf16.mxu0 %vm268_vm0, %v2021_v3  ;;  %v2036_v18 = vld [vmem:[%s2626_s0 + $0x88] sm:$0xff]   ;;  %v2037_v19 = vld [vmem:[%s2626_s0 + $0x90] sm:$0xff]   ;;  %v2038_v20 = vld [vmem:[%s2626_s0 + $0x98] sm:$0xff]  }
   0x8   :  { %v2051_v21 = vld [vmem:[%s2627_s3 + $0x8] sm:$0xff]   ;;  %v2039_v22 = vld [vmem:[%s2626_s0 + $0xa0] sm:$0xff]   ;;  %v2041_v25 = vld [vmem:[%s2626_s0 + $0xb0] sm:$0xff]  }
   0x9   :  { %1948 = vmatprep.subr.bf16.mxu1 %v2051_v21  ;;  %v2052_v23 = vld [vmem:[%s2627_s3] sm:$0xff]   ;;  %v2040_v24 = vld [vmem:[%s2626_s0 + $0xa8] sm:$0xff]   ;;  %v2042_v26 = vld [vmem:[%s2626_s0 + $0xb8] sm:$0xff]  }
   0xa   :  { %1949 = vmatpush3.bf16.msra.mxu1 %v2051_v21  ;;  %v2043_v27 = vld [vmem:[%s2626_s0 + $0xc0] sm:$0xff]   ;;  %v2044_v28 = vld [vmem:[%s2626_s0 + $0xc8] sm:$0xff]   ;;  %v2045_v29 = vld [vmem:[%s2626_s0 + $0xd0] sm:$0xff]  }
   0xb   :  { %1950 = vmatprep.subr.bf16.mxu1 %v2052_v23  ;;  %v2046_v30 = vld [vmem:[%s2626_s0 + $0xd8] sm:$0xff]   ;;  %v2047_v31 = vld [vmem:[%s2626_s0 + $0xe0] sm:$0xff]   ;;  %v2048_v32 = vld [vmem:[%s2626_s0 + $0xe8] sm:$0xff]  }
   0xc   :  { %v2049_v33 = vld [vmem:[%s2626_s0 + $0xf0] sm:$0xff]   ;;  %v2050_v34 = vld [vmem:[%s2626_s0 + $0xf8] sm:$0xff]   ;;  %v2234_v37 = vld [vmem:[%s2628_s2] ss:$0 sm:$0xff] }
   0xe   :  { %1889 = vmatmul.mubr.msk.bf16.gmra.mxu0 %vm268_vm0, %v2022_v4  ;;  %1951 = vmatpush3.bf16.msra.mxu1 %v2052_v23 }
   0xf   :  { %1892 = vmatprep.mubr.msk.bf16.mxu0 %vm268_vm0, %v2023_v5 }
  0x16   :  { %1893 = vmatmul.mubr.msk.bf16.gmra.mxu0 %vm268_vm0, %v2024_v6 }
  0x17   :  { %1896 = vmatprep.mubr.msk.bf16.mxu0 %vm268_vm0, %v2025_v7 }
  0x1e   :  { %1897 = vmatmul.mubr.msk.bf16.gmra.mxu0 %vm268_vm0, %v2026_v8 }
  0x1f   :  { %1900 = vmatprep.mubr.msk.bf16.mxu0 %vm268_vm0, %v2027_v9 }
  0x26   :  { %1901 = vmatmul.mubr.msk.bf16.gmra.mxu0 %vm268_vm0, %v2028_v10 }
  0x27   :  { %1904 = vmatprep.mubr.msk.bf16.mxu0 %vm268_vm0, %v2029_v11 }
  0x2e   :  { %1905 = vmatmul.mubr.msk.bf16.gmra.mxu0 %vm268_vm0, %v2030_v12 }
  0x2f   :  { %1908 = vmatprep.mubr.msk.bf16.mxu0 %vm268_vm0, %v2031_v13 }
  0x36   :  { %1909 = vmatmul.mubr.msk.bf16.gmra.mxu0 %vm268_vm0, %v2032_v14 }
  0x37   :  { %1912 = vmatprep.mubr.msk.bf16.mxu0 %vm268_vm0, %v2033_v15 }
  0x3e   :  { %1913 = vmatmul.mubr.msk.bf16.gmra.mxu0 %vm268_vm0, %v2034_v16 }
  0x3f   :  { %1916 = vmatprep.mubr.msk.bf16.mxu0 %vm268_vm0, %v2035_v17 }
  0x46   :  { %1917 = vmatmul.mubr.msk.bf16.gmra.mxu0 %vm268_vm0, %v2036_v18 }
  0x47   :  { %1920 = vmatprep.mubr.msk.bf16.mxu0 %vm268_vm0, %v2037_v19 }
  0x4e   :  { %1921 = vmatmul.mubr.msk.bf16.gmra.mxu0 %vm268_vm0, %v2038_v20 }
  0x4f   :  { %1924 = vmatprep.mubr.msk.bf16.mxu0 %vm268_vm0, %v2039_v22 }
  0x56   :  { %1925 = vmatmul.mubr.msk.bf16.gmra.mxu0 %vm268_vm0, %v2040_v24 }
  0x57   :  { %1928 = vmatprep.mubr.msk.bf16.mxu0 %vm268_vm0, %v2041_v25 }
  0x5e   :  { %1929 = vmatmul.mubr.msk.bf16.gmra.mxu0 %vm268_vm0, %v2042_v26 }
  0x5f   :  { %1932 = vmatprep.mubr.msk.bf16.mxu0 %vm268_vm0, %v2043_v27 }
  0x66   :  { %1933 = vmatmul.mubr.msk.bf16.gmra.mxu0 %vm268_vm0, %v2044_v28 }
  0x67   :  { %1936 = vmatprep.mubr.msk.bf16.mxu0 %vm268_vm0, %v2045_v29 }
  0x6e   :  { %1937 = vmatmul.mubr.msk.bf16.gmra.mxu0 %vm268_vm0, %v2046_v30 }
  0x6f   :  { %1940 = vmatprep.mubr.msk.bf16.mxu0 %vm268_vm0, %v2047_v31 }
  0x76   :  { %1941 = vmatmul.mubr.msk.bf16.gmra.mxu0 %vm268_vm0, %v2048_v32 }
  0x77   :  { %1944 = vmatprep.mubr.msk.bf16.mxu0 %vm268_vm0, %v2049_v33 }
  0x7e   :  { %1945 = vmatmul.mubr.msk.bf16.gmra.mxu0 %vm268_vm0, %v2050_v34 }
  0xc6   :  { %v1886_v35 = vpop.f32.mrf.mxu0 }
  0xc7   :  { %v408_v41 = vadd.f32 %v1886_v35, %v2234_v37 }
  0xc8   :  { %v399_v36 = vpop.f32.mrf.mxu0 }
  0xc9   :  { %v400_v39 = vadd.f32 %v2234_v37, %v399_v36  ;;  %v656_v48 = vmax.f32 %v408_v41, 0.0 }
  0xca   :  { %v1887_v38 = vpop.f32.mrf.mxu0 }
  0xcb   :  { %v411_v40 = vadd.f32 %v1887_v38, %v2234_v37  ;;  %v654_v46 = vmax.f32 %v400_v39, 0.0 }
  0xcc   :  { %v402_v42 = vpop.f32.mrf.mxu0 }
  0xcd   :  { %v403_v43 = vadd.f32 %v2234_v37, %v402_v42  ;;  %v657_v44 = vmax.f32 %v411_v40, 0.0 }
  0xce   :  { %v1890_v45 = vpop.f32.mrf.mxu0 }
  0xcf   :  { %v655_v47 = vmax.f32 %v403_v43, 0.0  ;;  %v719_v51 = vpack.c.bf16 %v657_v44, %v656_v48  ;;  %v424_v55 = vadd.f32 %v1890_v45, %v2234_v37 }
  0xd0   :  { %v415_v49 = vpop.f32.mrf.mxu0 }
  0xd1   :  { %v718_v50 = vpack.c.bf16 %v655_v47, %v654_v46  ;;  %v416_v53 = vadd.f32 %v2234_v37, %v415_v49  ;;  %v660_v62 = vmax.f32 %v424_v55, 0.0 }
  0xd2   :  { %v1891_v52 = vpop.f32.mrf.mxu0 }
  0xd3   :  { %v427_v54 = vadd.f32 %v1891_v52, %v2234_v37  ;;  %1952 = vmatprep.mubr.msk.bf16.mxu1 %vm773_vm1, %v718_v50  ;;  %v658_v60 = vmax.f32 %v416_v53, 0.0 }
  0xd4   :  { %v418_v56 = vpop.f32.mrf.mxu0  ;;  %1953 = vmatmul.mubr.msk.bf16.vlgmr.msra.gmra.mxu1 %vm773_vm1, %v719_v51 }
  0xd5   :  { %v419_v57 = vadd.f32 %v2234_v37, %v418_v56  ;;  %v661_v58 = vmax.f32 %v427_v54, 0.0 }
  0xd6   :  { %v1894_v59 = vpop.f32.mrf.mxu0 }
  0xd7   :  { %v659_v61 = vmax.f32 %v419_v57, 0.0  ;;  %v721_v1 = vpack.c.bf16 %v661_v58, %v660_v62  ;;  %v440_v5 = vadd.f32 %v1894_v59, %v2234_v37 }
  0xd8   :  { %v431_v63 = vpop.f32.mrf.mxu0 }
  0xd9   :  { %v720_v0 = vpack.c.bf16 %v659_v61, %v658_v60  ;;  %v432_v3 = vadd.f32 %v2234_v37, %v431_v63  ;;  %v664_v12 = vmax.f32 %v440_v5, 0.0 }
  0xda   :  { %v1895_v2 = vpop.f32.mrf.mxu0 }
  0xdb   :  { %v443_v4 = vadd.f32 %v1895_v2, %v2234_v37  ;;  %1956 = vmatprep.mubr.msk.bf16.mxu1 %vm773_vm1, %v720_v0  ;;  %v662_v10 = vmax.f32 %v432_v3, 0.0 }
  0xdc   :  { %v434_v6 = vpop.f32.mrf.mxu0  ;;  %1957 = vmatmul.mubr.msk.bf16.gmra.mxu1 %vm773_vm1, %v721_v1 }
  0xdd   :  { %v435_v7 = vadd.f32 %v2234_v37, %v434_v6  ;;  %v665_v8 = vmax.f32 %v443_v4, 0.0 }
  0xde   :  { %v1898_v9 = vpop.f32.mrf.mxu0 }
  0xdf   :  { %v663_v11 = vmax.f32 %v435_v7, 0.0  ;;  %v723_v15 = vpack.c.bf16 %v665_v8, %v664_v12  ;;  %v456_v19 = vadd.f32 %v1898_v9, %v2234_v37 }
  0xe0   :  { %v447_v13 = vpop.f32.mrf.mxu0 }
  0xe1   :  { %v722_v14 = vpack.c.bf16 %v663_v11, %v662_v10  ;;  %v448_v17 = vadd.f32 %v2234_v37, %v447_v13  ;;  %v668_v26 = vmax.f32 %v456_v19, 0.0 }
  0xe2   :  { %v1899_v16 = vpop.f32.mrf.mxu0 }
  0xe3   :  { %v459_v18 = vadd.f32 %v1899_v16, %v2234_v37  ;;  %1960 = vmatprep.mubr.msk.bf16.mxu1 %vm773_vm1, %v722_v14  ;;  %v666_v24 = vmax.f32 %v448_v17, 0.0 }
  0xe4   :  { %v450_v20 = vpop.f32.mrf.mxu0  ;;  %1961 = vmatmul.mubr.msk.bf16.gmra.mxu1 %vm773_vm1, %v723_v15 }
  0xe5   :  { %v451_v21 = vadd.f32 %v2234_v37, %v450_v20  ;;  %v669_v22 = vmax.f32 %v459_v18, 0.0 }
  0xe6   :  { %v1902_v23 = vpop.f32.mrf.mxu0 }
  0xe7   :  { %v667_v25 = vmax.f32 %v451_v21, 0.0  ;;  %v725_v29 = vpack.c.bf16 %v669_v22, %v668_v26  ;;  %v472_v33 = vadd.f32 %v1902_v23, %v2234_v37 }
  0xe8   :  { %v463_v27 = vpop.f32.mrf.mxu0 }
  0xe9   :  { %v724_v28 = vpack.c.bf16 %v667_v25, %v666_v24  ;;  %v464_v31 = vadd.f32 %v2234_v37, %v463_v27  ;;  %v672_v41 = vmax.f32 %v472_v33, 0.0 }
  0xea   :  { %v1903_v30 = vpop.f32.mrf.mxu0 }
  0xeb   :  { %v475_v32 = vadd.f32 %v1903_v30, %v2234_v37  ;;  %1964 = vmatprep.mubr.msk.bf16.mxu1 %vm773_vm1, %v724_v28  ;;  %v670_v39 = vmax.f32 %v464_v31, 0.0 }
  0xec   :  { %v466_v34 = vpop.f32.mrf.mxu0  ;;  %1965 = vmatmul.mubr.msk.bf16.gmra.mxu1 %vm773_vm1, %v725_v29 }
  0xed   :  { %v467_v35 = vadd.f32 %v2234_v37, %v466_v34  ;;  %v673_v36 = vmax.f32 %v475_v32, 0.0 }
  0xee   :  { %v1906_v38 = vpop.f32.mrf.mxu0 }
  0xef   :  { %v671_v40 = vmax.f32 %v467_v35, 0.0  ;;  %v727_v44 = vpack.c.bf16 %v673_v36, %v672_v41  ;;  %v488_v48 = vadd.f32 %v1906_v38, %v2234_v37 }
  0xf0   :  { %v479_v42 = vpop.f32.mrf.mxu0 }
  0xf1   :  { %v726_v43 = vpack.c.bf16 %v671_v40, %v670_v39  ;;  %v480_v46 = vadd.f32 %v2234_v37, %v479_v42  ;;  %v676_v55 = vmax.f32 %v488_v48, 0.0 }
  0xf2   :  { %v1907_v45 = vpop.f32.mrf.mxu0 }
  0xf3   :  { %v491_v47 = vadd.f32 %v1907_v45, %v2234_v37  ;;  %1968 = vmatprep.mubr.msk.bf16.mxu1 %vm773_vm1, %v726_v43  ;;  %v674_v53 = vmax.f32 %v480_v46, 0.0 }
  0xf4   :  { %v482_v49 = vpop.f32.mrf.mxu0  ;;  %1969 = vmatmul.mubr.msk.bf16.gmra.mxu1 %vm773_vm1, %v727_v44 }
  0xf5   :  { %v483_v50 = vadd.f32 %v2234_v37, %v482_v49  ;;  %v677_v51 = vmax.f32 %v491_v47, 0.0 }
  0xf6   :  { %v1910_v52 = vpop.f32.mrf.mxu0 }
  0xf7   :  { %v675_v54 = vmax.f32 %v483_v50, 0.0  ;;  %v729_v58 = vpack.c.bf16 %v677_v51, %v676_v55  ;;  %v504_v62 = vadd.f32 %v1910_v52, %v2234_v37 }
  0xf8   :  { %v495_v56 = vpop.f32.mrf.mxu0 }
  0xf9   :  { %v728_v57 = vpack.c.bf16 %v675_v54, %v674_v53  ;;  %v496_v60 = vadd.f32 %v2234_v37, %v495_v56  ;;  %v680_v5 = vmax.f32 %v504_v62, 0.0 }
  0xfa   :  { %v1911_v59 = vpop.f32.mrf.mxu0 }
  0xfb   :  { %v507_v61 = vadd.f32 %v1911_v59, %v2234_v37  ;;  %1972 = vmatprep.mubr.msk.bf16.mxu1 %vm773_vm1, %v728_v57  ;;  %v678_v3 = vmax.f32 %v496_v60, 0.0 }
  0xfc   :  { %v498_v63 = vpop.f32.mrf.mxu0  ;;  %1973 = vmatmul.mubr.msk.bf16.gmra.mxu1 %vm773_vm1, %v729_v58 }
  0xfd   :  { %v499_v0 = vadd.f32 %v2234_v37, %v498_v63  ;;  %v681_v1 = vmax.f32 %v507_v61, 0.0 }
  0xfe   :  { %v1914_v2 = vpop.f32.mrf.mxu0 }
  0xff   :  { %v679_v4 = vmax.f32 %v499_v0, 0.0  ;;  %v731_v8 = vpack.c.bf16 %v681_v1, %v680_v5  ;;  %v520_v12 = vadd.f32 %v1914_v2, %v2234_v37 }
 0x100   :  { %v511_v6 = vpop.f32.mrf.mxu0 }
 0x101   :  { %v730_v7 = vpack.c.bf16 %v679_v4, %v678_v3  ;;  %v512_v10 = vadd.f32 %v2234_v37, %v511_v6  ;;  %v684_v19 = vmax.f32 %v520_v12, 0.0 }
 0x102   :  { %v1915_v9 = vpop.f32.mrf.mxu0 }
 0x103   :  { %v523_v11 = vadd.f32 %v1915_v9, %v2234_v37  ;;  %1976 = vmatprep.mubr.msk.bf16.mxu1 %vm773_vm1, %v730_v7  ;;  %v682_v17 = vmax.f32 %v512_v10, 0.0 }
 0x104   :  { %v514_v13 = vpop.f32.mrf.mxu0  ;;  %1977 = vmatmul.mubr.msk.bf16.gmra.mxu1 %vm773_vm1, %v731_v8 }
 0x105   :  { %v515_v14 = vadd.f32 %v2234_v37, %v514_v13  ;;  %v685_v15 = vmax.f32 %v523_v11, 0.0 }
 0x106   :  { %v1918_v16 = vpop.f32.mrf.mxu0 }
 0x107   :  { %v683_v18 = vmax.f32 %v515_v14, 0.0  ;;  %v733_v22 = vpack.c.bf16 %v685_v15, %v684_v19  ;;  %v536_v26 = vadd.f32 %v1918_v16, %v2234_v37 }
 0x108   :  { %v527_v20 = vpop.f32.mrf.mxu0 }
 0x109   :  { %v732_v21 = vpack.c.bf16 %v683_v18, %v682_v17  ;;  %v528_v24 = vadd.f32 %v2234_v37, %v527_v20  ;;  %v688_v33 = vmax.f32 %v536_v26, 0.0 }
 0x10a   :  { %v1919_v23 = vpop.f32.mrf.mxu0 }
 0x10b   :  { %v539_v25 = vadd.f32 %v1919_v23, %v2234_v37  ;;  %1980 = vmatprep.mubr.msk.bf16.mxu1 %vm773_vm1, %v732_v21  ;;  %v686_v31 = vmax.f32 %v528_v24, 0.0 }
 0x10c   :  { %v530_v27 = vpop.f32.mrf.mxu0  ;;  %1981 = vmatmul.mubr.msk.bf16.gmra.mxu1 %vm773_vm1, %v733_v22 }
 0x10d   :  { %v531_v28 = vadd.f32 %v2234_v37, %v530_v27  ;;  %v689_v29 = vmax.f32 %v539_v25, 0.0 }
 0x10e   :  { %v1922_v30 = vpop.f32.mrf.mxu0 }
 0x10f   :  { %v687_v32 = vmax.f32 %v531_v28, 0.0  ;;  %v735_v36 = vpack.c.bf16 %v689_v29, %v688_v33  ;;  %v552_v41 = vadd.f32 %v1922_v30, %v2234_v37 }
 0x110   :  { %v543_v34 = vpop.f32.mrf.mxu0 }
 0x111   :  { %v734_v35 = vpack.c.bf16 %v687_v32, %v686_v31  ;;  %v544_v39 = vadd.f32 %v2234_v37, %v543_v34  ;;  %v692_v48 = vmax.f32 %v552_v41, 0.0 }
 0x112   :  { %v1923_v38 = vpop.f32.mrf.mxu0 }
 0x113   :  { %v555_v40 = vadd.f32 %v1923_v38, %v2234_v37  ;;  %1984 = vmatprep.mubr.msk.bf16.mxu1 %vm773_vm1, %v734_v35  ;;  %v690_v46 = vmax.f32 %v544_v39, 0.0 }
 0x114   :  { %v546_v42 = vpop.f32.mrf.mxu0  ;;  %1985 = vmatmul.mubr.msk.bf16.gmra.mxu1 %vm773_vm1, %v735_v36 }
 0x115   :  { %v547_v43 = vadd.f32 %v2234_v37, %v546_v42  ;;  %v693_v44 = vmax.f32 %v555_v40, 0.0 }
 0x116   :  { %v1926_v45 = vpop.f32.mrf.mxu0 }
 0x117   :  { %v691_v47 = vmax.f32 %v547_v43, 0.0  ;;  %v737_v51 = vpack.c.bf16 %v693_v44, %v692_v48  ;;  %v568_v55 = vadd.f32 %v1926_v45, %v2234_v37 }
 0x118   :  { %v559_v49 = vpop.f32.mrf.mxu0 }
 0x119   :  { %v736_v50 = vpack.c.bf16 %v691_v47, %v690_v46  ;;  %v560_v53 = vadd.f32 %v2234_v37, %v559_v49  ;;  %v696_v62 = vmax.f32 %v568_v55, 0.0 }
 0x11a   :  { %v1927_v52 = vpop.f32.mrf.mxu0 }
 0x11b   :  { %v571_v54 = vadd.f32 %v1927_v52, %v2234_v37  ;;  %1988 = vmatprep.mubr.msk.bf16.mxu1 %vm773_vm1, %v736_v50  ;;  %v694_v60 = vmax.f32 %v560_v53, 0.0 }
 0x11c   :  { %v562_v56 = vpop.f32.mrf.mxu0  ;;  %1989 = vmatmul.mubr.msk.bf16.gmra.mxu1 %vm773_vm1, %v737_v51 }
 0x11d   :  { %v563_v57 = vadd.f32 %v2234_v37, %v562_v56  ;;  %v697_v58 = vmax.f32 %v571_v54, 0.0 }
 0x11e   :  { %v1930_v59 = vpop.f32.mrf.mxu0 }
 0x11f   :  { %v695_v61 = vmax.f32 %v563_v57, 0.0  ;;  %v739_v1 = vpack.c.bf16 %v697_v58, %v696_v62  ;;  %v584_v5 = vadd.f32 %v1930_v59, %v2234_v37 }
 0x120   :  { %v575_v63 = vpop.f32.mrf.mxu0 }
 0x121   :  { %v738_v0 = vpack.c.bf16 %v695_v61, %v694_v60  ;;  %v576_v3 = vadd.f32 %v2234_v37, %v575_v63  ;;  %v700_v12 = vmax.f32 %v584_v5, 0.0 }
 0x122   :  { %v1931_v2 = vpop.f32.mrf.mxu0 }
 0x123   :  { %v587_v4 = vadd.f32 %v1931_v2, %v2234_v37  ;;  %1992 = vmatprep.mubr.msk.bf16.mxu1 %vm773_vm1, %v738_v0  ;;  %v698_v10 = vmax.f32 %v576_v3, 0.0 }
 0x124   :  { %v578_v6 = vpop.f32.mrf.mxu0  ;;  %1993 = vmatmul.mubr.msk.bf16.gmra.mxu1 %vm773_vm1, %v739_v1 }
 0x125   :  { %v579_v7 = vadd.f32 %v2234_v37, %v578_v6  ;;  %v701_v8 = vmax.f32 %v587_v4, 0.0 }
 0x126   :  { %v1934_v9 = vpop.f32.mrf.mxu0 }
 0x127   :  { %v699_v11 = vmax.f32 %v579_v7, 0.0  ;;  %v741_v15 = vpack.c.bf16 %v701_v8, %v700_v12  ;;  %v600_v19 = vadd.f32 %v1934_v9, %v2234_v37 }
 0x128   :  { %v591_v13 = vpop.f32.mrf.mxu0 }
 0x129   :  { %v740_v14 = vpack.c.bf16 %v699_v11, %v698_v10  ;;  %v592_v17 = vadd.f32 %v2234_v37, %v591_v13  ;;  %v704_v26 = vmax.f32 %v600_v19, 0.0 }
 0x12a   :  { %v1935_v16 = vpop.f32.mrf.mxu0 }
 0x12b   :  { %v603_v18 = vadd.f32 %v1935_v16, %v2234_v37  ;;  %1996 = vmatprep.mubr.msk.bf16.mxu1 %vm773_vm1, %v740_v14  ;;  %v702_v24 = vmax.f32 %v592_v17, 0.0 }
 0x12c   :  { %v594_v20 = vpop.f32.mrf.mxu0  ;;  %1997 = vmatmul.mubr.msk.bf16.gmra.mxu1 %vm773_vm1, %v741_v15 }
 0x12d   :  { %v595_v21 = vadd.f32 %v2234_v37, %v594_v20  ;;  %v705_v22 = vmax.f32 %v603_v18, 0.0 }
 0x12e   :  { %v1938_v23 = vpop.f32.mrf.mxu0 }
 0x12f   :  { %v703_v25 = vmax.f32 %v595_v21, 0.0  ;;  %v743_v29 = vpack.c.bf16 %v705_v22, %v704_v26  ;;  %v616_v33 = vadd.f32 %v1938_v23, %v2234_v37 }
 0x130   :  { %v607_v27 = vpop.f32.mrf.mxu0 }
 0x131   :  { %v742_v28 = vpack.c.bf16 %v703_v25, %v702_v24  ;;  %v608_v31 = vadd.f32 %v2234_v37, %v607_v27  ;;  %v708_v41 = vmax.f32 %v616_v33, 0.0 }
 0x132   :  { %v1939_v30 = vpop.f32.mrf.mxu0 }
 0x133   :  { %v619_v32 = vadd.f32 %v1939_v30, %v2234_v37  ;;  %2000 = vmatprep.mubr.msk.bf16.mxu1 %vm773_vm1, %v742_v28  ;;  %v706_v39 = vmax.f32 %v608_v31, 0.0 }
 0x134   :  { %v610_v34 = vpop.f32.mrf.mxu0  ;;  %2001 = vmatmul.mubr.msk.bf16.gmra.mxu1 %vm773_vm1, %v743_v29 }
 0x135   :  { %v611_v35 = vadd.f32 %v2234_v37, %v610_v34  ;;  %v709_v36 = vmax.f32 %v619_v32, 0.0 }
 0x136   :  { %v1942_v38 = vpop.f32.mrf.mxu0 }
 0x137   :  { %v707_v40 = vmax.f32 %v611_v35, 0.0  ;;  %v745_v44 = vpack.c.bf16 %v709_v36, %v708_v41  ;;  %v632_v48 = vadd.f32 %v1942_v38, %v2234_v37  ;;  %v2377_v36 = vld [vmem:[%s2629_s4] ss:$0 sm:$0xff] }
 0x138   :  { %v623_v42 = vpop.f32.mrf.mxu0 }
 0x139   :  { %v744_v43 = vpack.c.bf16 %v707_v40, %v706_v39  ;;  %v624_v46 = vadd.f32 %v2234_v37, %v623_v42  ;;  %v712_v55 = vmax.f32 %v632_v48, 0.0  ;;  %v2385_v42 = vld [vmem:[%s2630_s5] sm:$0xff] }
 0x13a   :  { %v1943_v45 = vpop.f32.mrf.mxu0  ;;  %1846 = vmatprep.mubr.msk.f32.mxu0 %vm773_vm1, %v2385_v42 }
 0x13b   :  { %v635_v47 = vadd.f32 %v1943_v45, %v2234_v37  ;;  %2004 = vmatprep.mubr.msk.bf16.mxu1 %vm773_vm1, %v744_v43  ;;  %v710_v53 = vmax.f32 %v624_v46, 0.0 }
 0x13c   :  { %v626_v49 = vpop.f32.mrf.mxu0  ;;  %2005 = vmatmul.mubr.msk.bf16.gmra.mxu1 %vm773_vm1, %v745_v44 }
 0x13d   :  { %v627_v50 = vadd.f32 %v2234_v37, %v626_v49  ;;  %v713_v51 = vmax.f32 %v635_v47, 0.0 }
 0x13e   :  { %v1946_v52 = vpop.f32.mrf.mxu0 }
 0x13f   :  { %v711_v54 = vmax.f32 %v627_v50, 0.0  ;;  %v747_v58 = vpack.c.bf16 %v713_v51, %v712_v55  ;;  %v648_v62 = vadd.f32 %v1946_v52, %v2234_v37  ;;  %v2053_v51 = vmov 0  }
 0x140   :  { %v639_v56 = vpop.f32.mrf.mxu0  ;;  %2017 = vset.pattern.permute.xlu0 %v2053_v51  ;;  %v12_v52 = vstv %s2631_s6 }
 0x141   :  { %v746_v57 = vpack.c.bf16 %v711_v54, %v710_v53  ;;  %v640_v60 = vadd.f32 %v2234_v37, %v639_v56  ;;  %v716_v4 = vmax.f32 %v648_v62, 0.0  ;;  %13 = vst [vmem:[#allocation2] sm:$0x1] %v12_v52 }
 0x142   :  { %v1947_v59 = vpop.f32.mrf.mxu0 }
 0x143   :  { %v651_v61 = vadd.f32 %v1947_v59, %v2234_v37  ;;  %2008 = vmatprep.mubr.msk.bf16.mxu1 %vm773_vm1, %v746_v57  ;;  %v714_v2 = vmax.f32 %v640_v60, 0.0 }
 0x144   :  { %v642_v63 = vpop.f32.mrf.mxu0  ;;  %2009 = vmatmul.mubr.msk.bf16.gmra.mxu1 %vm773_vm1, %v747_v58 }
 0x145   :  { %v643_v0 = vadd.f32 %v2234_v37, %v642_v63  ;;  %v717_v1 = vmax.f32 %v651_v61, 0.0 }
 0x147   :  { %v715_v3 = vmax.f32 %v643_v0, 0.0  ;;  %v749_v6 = vpack.c.bf16 %v717_v1, %v716_v4 }
 0x148   :  { %v1680_v1 = vld [vmem:[#allocation2] ss:$0 sm:$0xff] }
 0x149   :  { %v748_v5 = vpack.c.bf16 %v715_v3, %v714_v2  ;;  %1231 = vperm.xlu0 %2017, %v1680_v1  }
 0x14b   :  { %2012 = vmatprep.mubr.msk.bf16.mxu1 %vm773_vm1, %v748_v5 }
 0x14c   :  { %2013 = vmatmul.mubr.msk.bf16.gmra.mxu1 %vm773_vm1, %v749_v6 }
 0x14d   :  { %1880 = vmatprep.mubr.msk.f32.mxu1 %vm773_vm1, %v2385_v42 }
 0x194   :  { %v2332_v7 = vpop.f32.mrf.mxu1 }
 0x196   :  { %v2334_v8 = vpop.f32.mrf.mxu1 }
 0x198   :  { %v2336_v9 = vpop.f32.mrf.mxu1 }
 0x19a   :  { %v2338_v10 = vpop.f32.mrf.mxu1 }
 0x19c   :  { %v2340_v11 = vpop.f32.mrf.mxu1 }
 0x19e   :  { %v2342_v37 = vpop.f32.mrf.mxu1 }
 0x1a0   :  { %v2344_v12 = vpop.f32.mrf.mxu1 }
 0x1a2   :  { %v2346_v13 = vpop.f32.mrf.mxu1 }
 0x1a4   :  { %v2348_v14 = vpop.f32.mrf.mxu1 }
 0x1a6   :  { %v2350_v15 = vpop.f32.mrf.mxu1 }
 0x1a8   :  { %v2352_v16 = vpop.f32.mrf.mxu1 }
 0x1a9   :  { %v948_v2 = vadd.f32 %v2352_v16, %v2377_v36 }
 0x1aa   :  { %v2354_v17 = vpop.f32.mrf.mxu1 }
 0x1ac   :  { %v1966_v18 = vpop.f32.mrf.mxu1 }
 0x1ad   :  { %v961_v45 = vadd.f32 %v1966_v18, %v2377_v36 }
 0x1ae   :  { %v952_v19 = vpop.f32.mrf.mxu1 }
 0x1af   :  { %v1173_v53 = vmax.f32 %v961_v45, 0.0  ;;  %v953_v59 = vadd.f32 %v2377_v36, %v952_v19  ;;  %v945_v19 = vadd.f32 %v2348_v14, %v2377_v36 }
 0x1b0   :  { %v1967_v20 = vpop.f32.mrf.mxu1 }
 0x1b1   :  { %v964_v38 = vadd.f32 %v1967_v20, %v2377_v36  ;;  %v1171_v3 = vmax.f32 %v953_v59, 0.0  ;;  %v1170_v20 = vmax.f32 %v948_v2, 0.0 }
 0x1b2   :  { %v955_v21 = vpop.f32.mrf.mxu1 }
 0x1b3   :  { %v1174_v46 = vmax.f32 %v964_v38, 0.0  ;;  %v956_v54 = vadd.f32 %v2377_v36, %v955_v21 }
 0x1b4   :  { %v2356_v22 = vpop.f32.mrf.mxu1 }
 0x1b5   :  { %v1172_v60 = vmax.f32 %v956_v54, 0.0 }
 0x1b6   :  { %v2358_v23 = vpop.f32.mrf.mxu1 }
 0x1b8   :  { %v2360_v24 = vpop.f32.mrf.mxu1 }
 0x1ba   :  { %v2362_v25 = vpop.f32.mrf.mxu1 }
 0x1bc   :  { %v2364_v26 = vpop.f32.mrf.mxu1 }
 0x1be   :  { %v2366_v27 = vpop.f32.mrf.mxu1 }
 0x1c0   :  { %v2368_v28 = vpop.f32.mrf.mxu1 }
 0x1c2   :  { %v2370_v29 = vpop.f32.mrf.mxu1 }
 0x1c4   :  { %v1978_v30 = vpop.f32.mrf.mxu1 }
 0x1c5   :  { %v1009_v5 = vadd.f32 %v1978_v30, %v2377_v36  ;;  %v1169_v30 = vmax.f32 %v945_v19, 0.0 }
 0x1c6   :  { %v2372_v31 = vpop.f32.mrf.mxu1 }
 0x1c7   :  { %v1001_v14 = vadd.f32 %v2377_v36, %v2372_v31  ;;  %v932_v31 = vadd.f32 %v2344_v12, %v2377_v36  ;;  %v988_v12 = vadd.f32 %v2377_v36, %v2370_v29  ;;  %v921_v29 = vadd.f32 %v2377_v36, %v2342_v37 }
 0x1c8   :  { %v1979_v32 = vpop.f32.mrf.mxu1  ;;  %v977_v37 = vadd.f32 %v2356_v22, %v2377_v36 }
 0x1c9   :  { %v1012_v62 = vadd.f32 %v1979_v32, %v2377_v36  ;;  %v1185_v32 = vmax.f32 %v1009_v5, 0.0  ;;  %v1166_v52 = vmax.f32 %v932_v31, 0.0  ;;  %v1163_v5 = vmax.f32 %v921_v29, 0.0 }
 0x1ca   :  { %v1003_v33 = vpop.f32.mrf.mxu1 }
 0x1cb   :  { %v1186_v6 = vmax.f32 %v1012_v62, 0.0  ;;  %v1004_v16 = vadd.f32 %v2377_v36, %v1003_v33  ;;  %v937_v33 = vadd.f32 %v2377_v36, %v2350_v15  ;;  %v993_v15 = vadd.f32 %v2364_v26, %v2377_v36 }
 0x1cc   :  { %v1982_v34 = vpop.f32.mrf.mxu1 }
 0x1cd   :  { %v1025_v40 = vadd.f32 %v1982_v34, %v2377_v36  ;;  %v1181_v54 = vmax.f32 %v993_v15, 0.0 }
 0x1ce   :  { %v1016_v35 = vpop.f32.mrf.mxu1 }
 0x1cf   :  { %v1189_v48 = vmax.f32 %v1025_v40, 0.0  ;;  %v1017_v56 = vadd.f32 %v2377_v36, %v1016_v35  ;;  %v940_v35 = vadd.f32 %v2377_v36, %v2354_v17  ;;  %v996_v17 = vadd.f32 %v2368_v28, %v2377_v36 }
 0x1d0   :  { %v1983_v39 = vpop.f32.mrf.mxu1  ;;  %v929_v28 = vadd.f32 %v2340_v11, %v2377_v36  ;;  %v985_v11 = vadd.f32 %v2377_v36, %v2366_v27  ;;  %v916_v27 = vadd.f32 %v2336_v9, %v2377_v36  ;;  %v972_v9 = vadd.f32 %v2377_v36, %v2362_v25 }
 0x1d1   :  { %v1028_v41 = vadd.f32 %v1983_v39, %v2377_v36  ;;  %v1187_v63 = vmax.f32 %v1017_v56, 0.0  ;;  %v1184_v39 = vmax.f32 %v1004_v16, 0.0  ;;  %v905_v25 = vadd.f32 %v2377_v36, %v2334_v8 }
 0x1d2   :  { %v1019_v43 = vpop.f32.mrf.mxu1  ;;  %v1165_v26 = vmax.f32 %v929_v28, 0.0  ;;  %v1179_v2 = vmax.f32 %v985_v11, 0.0 }
 0x1d3   :  { %v1190_v44 = vmax.f32 %v1028_v41, 0.0  ;;  %v1020_v49 = vadd.f32 %v2377_v36, %v1019_v43  ;;  %v1168_v41 = vmax.f32 %v940_v35, 0.0 }
 0x1d4   :  { %v2392_v47 = vpop.f32.mrf.mxu1 }
 0x1d5   :  { %1814 = vmatprep.subr.msk.mxu0 %vm773_vm1, %v1190_v44  ;;  %v1188_v57 = vmax.f32 %v1020_v49, 0.0  ;;  %v1183_v44 = vmax.f32 %v1001_v14, 0.0  ;;  %v1182_v49 = vmax.f32 %v996_v17, 0.0  ;;  %v908_v14 = vadd.f32 %v2377_v36, %v2338_v10 }
 0x1d6   :  { %v2396_v50 = vpop.f32.mrf.mxu1  ;;  %1815 = vmatpush3.xpose.msk.msra.mxu0 %vm773_vm1, %v1174_v46  ;;  %v1167_v46 = vmax.f32 %v937_v33, 0.0  ;;  %v969_v33 = vadd.f32 %v2377_v36, %v2358_v23  ;;  %v1159_v10 = vmax.f32 %v905_v25, 0.0 }
 0x1d7   :  { %1816 = vmatprep.subr.msk.mxu0 %vm773_vm1, %v1189_v48  ;;  %v1160_v17 = vmax.f32 %v908_v14, 0.0 }
 0x1d8   :  { %v2404_v55 = vpop.f32.mrf.mxu1  ;;  %v1175_v31 = vmax.f32 %v969_v33, 0.0 }
 0x1da   :  { %v2407_v58 = vpop.f32.mrf.mxu1  ;;  %1817 = vmatpush3.xpose.msk.msra.mxu0 %vm773_vm1, %v1173_v53 }
 0x1db   :  { %1818 = vmatprep.subr.msk.mxu0 %vm773_vm1, %v1188_v57  ;;  %v924_v57 = vadd.f32 %v2377_v36, %v2346_v13  ;;  %v980_v13 = vadd.f32 %v2360_v24, %v2377_v36  ;;  %v913_v24 = vadd.f32 %v2332_v7, %v2377_v36  ;;  %v1176_v7 = vmax.f32 %v972_v9, 0.0 }
 0x1dc   :  { %v2412_v61 = vpop.f32.mrf.mxu1 }
 0x1dd   :  { %v1178_v19 = vmax.f32 %v980_v13, 0.0  ;;  %v1161_v22 = vmax.f32 %v913_v24, 0.0 }
 0x1de   :  { %v2415_v0 = vpop.f32.mrf.mxu1  ;;  %1819 = vmatpush3.xpose.msk.msra.mxu0 %vm773_vm1, %v1172_v60  ;;  %v1180_v60 = vmax.f32 %v988_v12, 0.0 }
 0x1df   :  { %1820 = vmatprep.subr.msk.mxu0 %vm773_vm1, %v1187_v63  ;;  %v1164_v63 = vmax.f32 %v924_v57, 0.0 }
 0x1e0   :  { %v2421_v4 = vpop.f32.mrf.mxu1 }
 0x1e2   :  { %v2424_v18 = vpop.f32.mrf.mxu1  ;;  %1821 = vmatpush3.xpose.msk.msra.mxu0 %vm773_vm1, %v1171_v3 }
 0x1e3   :  { %1822 = vmatprep.subr.msk.mxu0 %vm773_vm1, %v1186_v6 }
 0x1e4   :  { %v2430_v21 = vpop.f32.mrf.mxu1 }
 0x1e6   :  { %v2433_v34 = vpop.f32.mrf.mxu1  ;;  %1823 = vmatpush3.xpose.msk.msra.mxu0 %vm773_vm1, %v1170_v20 }
 0x1e7   :  { %1824 = vmatprep.subr.msk.mxu0 %vm773_vm1, %v1185_v32  ;;  %v1162_v32 = vmax.f32 %v916_v27, 0.0 }
 0x1e8   :  { %v2439_v38 = vpop.f32.mrf.mxu1 }
 0x1ea   :  { %v2443_v40 = vpop.f32.mrf.mxu1  ;;  %1825 = vmatpush3.xpose.msk.msra.mxu0 %vm773_vm1, %v1169_v30  ;;  %v1177_v30 = vmax.f32 %v977_v37, 0.0 }
 0x1eb   :  { %1826 = vmatprep.subr.msk.mxu0 %vm773_vm1, %v1184_v39 }
 0x1ec   :  { %v2449_v43 = vpop.f32.mrf.mxu1 }
 0x1ee   :  { %v2453_v45 = vpop.f32.mrf.mxu1  ;;  %1827 = vmatpush3.xpose.msk.msra.mxu0 %vm773_vm1, %v1168_v41 }
 0x1ef   :  { %1828 = vmatprep.subr.msk.mxu0 %vm773_vm1, %v1183_v44  ;;  %v1081_v29 = vadd.f32 %v2377_v36, %v2453_v45  ;;  %v1073_v45 = vadd.f32 %v2430_v21, %v2377_v36  ;;  %v1065_v21 = vadd.f32 %v2377_v36, %v2433_v34  ;;  %v1057_v34 = vadd.f32 %v2412_v61, %v2377_v36 }
 0x1f0   :  { %v1999_v48 = vpop.f32.mrf.mxu1  ;;  %v1049_v61 = vadd.f32 %v2377_v36, %v2415_v0  ;;  %v1041_v0 = vadd.f32 %v2392_v47, %v2377_v36  ;;  %v1033_v47 = vadd.f32 %v2377_v36, %v2396_v50 }
 0x1f1   :  { %v1092_v23 = vadd.f32 %v1999_v48, %v2377_v36  ;;  %v1203_v27 = vmax.f32 %v1081_v29, 0.0 }
 0x1f2   :  { %v2461_v51 = vpop.f32.mrf.mxu1  ;;  %1829 = vmatpush3.xpose.msk.msra.mxu0 %vm773_vm1, %v1167_v46 }
 0x1f3   :  { %1830 = vmatprep.subr.msk.mxu0 %vm773_vm1, %v1182_v49  ;;  %v1206_v12 = vmax.f32 %v1092_v23, 0.0  ;;  %v1084_v11 = vadd.f32 %v2377_v36, %v2461_v51  ;;  %v1076_v51 = vadd.f32 %v2439_v38, %v2377_v36  ;;  %v1201_v38 = vmax.f32 %v1073_v45, 0.0 }
 0x1f4   :  { %v2467_v53 = vpop.f32.mrf.mxu1 }
 0x1f6   :  { %v2471_v56 = vpop.f32.mrf.mxu1  ;;  %1831 = vmatpush3.xpose.msk.msra.mxu0 %vm773_vm1, %v1166_v52 }
 0x1f7   :  { %1832 = vmatprep.subr.msk.mxu0 %vm773_vm1, %v1181_v54  ;;  %v1089_v54 = vadd.f32 %v2449_v43, %v2377_v36 }
 0x1f8   :  { %v2477_v59 = vpop.f32.mrf.mxu1 }
 0x1f9   :  { %v1205_v48 = vmax.f32 %v1089_v54, 0.0  ;;  %v1191_v54 = vmax.f32 %v1033_v47, 0.0 }
 0x1fa   :  { %v2481_v62 = vpop.f32.mrf.mxu1  ;;  %1833 = vmatpush3.xpose.msk.msra.mxu0 %vm773_vm1, %v1165_v26 }
 0x1fb   :  { %1834 = vmatprep.subr.msk.mxu0 %vm773_vm1, %v1180_v60 }
 0x1fc   :  { %v2487_v1 = vpop.f32.mrf.mxu1 }
 0x1fd   :  { %v1121_v33 = vadd.f32 %v2487_v1, %v2377_v36  ;;  %v1052_v1 = vadd.f32 %v2377_v36, %v2424_v18  ;;  %v1044_v18 = vadd.f32 %v2404_v55, %v2377_v36  ;;  %v1193_v55 = vmax.f32 %v1041_v0, 0.0 }
 0x1fe   :  { %v2491_v3 = vpop.f32.mrf.mxu1  ;;  %1835 = vmatpush3.xpose.msk.msra.mxu0 %vm773_vm1, %v1164_v63  ;;  %v1204_v63 = vmax.f32 %v1084_v11, 0.0 }
 0x1ff   :  { %1836 = vmatprep.subr.msk.mxu0 %vm773_vm1, %v1179_v2 }
 0x200   :  { %v2497_v6 = vpop.f32.mrf.mxu1 }
 0x201   :  { %v1124_v14 = vadd.f32 %v2497_v6, %v2377_v36 }
 0x202   :  { %v2501_v20 = vpop.f32.mrf.mxu1  ;;  %1837 = vmatpush3.xpose.msk.msra.mxu0 %vm773_vm1, %v1163_v5 }
 0x203   :  { %1838 = vmatprep.subr.msk.mxu0 %vm773_vm1, %v1178_v19  ;;  %v1202_v19 = vmax.f32 %v1076_v51, 0.0  ;;  %v1116_v25 = vadd.f32 %v2377_v36, %v2501_v20  ;;  %v1196_v20 = vmax.f32 %v1052_v1, 0.0 }
 0x204   :  { %v2010_v16 = vpop.f32.mrf.mxu1 }
 0x205   :  { %v1137_v5 = vadd.f32 %v2010_v16, %v2377_v36  ;;  %v1068_v16 = vadd.f32 %v2377_v36, %v2443_v40  ;;  %v1060_v40 = vadd.f32 %v2421_v4, %v2377_v36  ;;  %v1197_v4 = vmax.f32 %v1057_v34, 0.0 }
 0x206   :  { %v1128_v35 = vpop.f32.mrf.mxu1  ;;  %1839 = vmatpush3.xpose.msk.msra.mxu0 %vm773_vm1, %v1162_v32 }
 0x207   :  { %1840 = vmatprep.subr.msk.mxu0 %vm773_vm1, %v1177_v30  ;;  %v1217_v24 = vmax.f32 %v1137_v5, 0.0  ;;  %v1129_v30 = vadd.f32 %v2377_v36, %v1128_v35  ;;  %v1199_v35 = vmax.f32 %v1065_v21, 0.0  ;;  %v1198_v6 = vmax.f32 %v1060_v40, 0.0 }
 0x208   :  { %v2011_v39 = vpop.f32.mrf.mxu1 }
 0x209   :  { %v1140_v13 = vadd.f32 %v2011_v39, %v2377_v36  ;;  %v1215_v39 = vmax.f32 %v1129_v30, 0.0 }
 0x20a   :  { %v1131_v41 = vpop.f32.mrf.mxu1  ;;  %1841 = vmatpush3.xpose.msk.msra.mxu0 %vm773_vm1, %v1161_v22  ;;  %v1200_v22 = vmax.f32 %v1068_v16, 0.0 }
 0x20b   :  { %1842 = vmatprep.subr.msk.mxu0 %vm773_vm1, %v1176_v7  ;;  %v1218_v37 = vmax.f32 %v1140_v13, 0.0  ;;  %v1132_v32 = vadd.f32 %v2377_v36, %v1131_v41  ;;  %v1214_v7 = vmax.f32 %v1124_v14, 0.0  ;;  %v1213_v41 = vmax.f32 %v1121_v33, 0.0 }
 0x20c   :  { %v2014_v44 = vpop.f32.mrf.mxu1 }
 0x20d   :  { %v1153_v49 = vadd.f32 %v2014_v44, %v2377_v36  ;;  %v1216_v9 = vmax.f32 %v1132_v32, 0.0  ;;  %v1212_v44 = vmax.f32 %v1116_v25, 0.0 }
 0x20e   :  { %v1144_v46 = vpop.f32.mrf.mxu1  ;;  %1843 = vmatpush3.xpose.msk.msra.mxu0 %vm773_vm1, %v1160_v17  ;;  %v1113_v17 = vadd.f32 %v2377_v36, %v2491_v3  ;;  %v1195_v3 = vmax.f32 %v1049_v61, 0.0 }
 0x20f   :  { %1844 = vmatprep.subr.msk.mxu0 %vm773_vm1, %v1175_v31  ;;  %v1221_v26 = vmax.f32 %v1153_v49, 0.0  ;;  %v1145_v60 = vadd.f32 %v2377_v36, %v1144_v46  ;;  %v1108_v31 = vadd.f32 %v2477_v59, %v2377_v36  ;;  %v1194_v59 = vmax.f32 %v1044_v18, 0.0 }
 0x210   :  { %v2015_v15 = vpop.f32.mrf.mxu1  ;;  %v1211_v46 = vmax.f32 %v1113_v17, 0.0  ;;  %v1100_v49 = vadd.f32 %v2377_v36, %v2481_v62 }
 0x211   :  { %v1156_v28 = vadd.f32 %v2015_v15, %v2377_v36  ;;  %v1219_v2 = vmax.f32 %v1145_v60, 0.0  ;;  %v1210_v23 = vmax.f32 %v1108_v31, 0.0 }
 0x212   :  { %v1147_v52 = vpop.f32.mrf.mxu1  ;;  %1845 = vmatpush3.xpose.msk.msra.mxu0 %vm773_vm1, %v1159_v10  ;;  %v1105_v10 = vadd.f32 %v2467_v53, %v2377_v36  ;;  %v1036_v53 = vadd.f32 %v2377_v36, %v2407_v58  ;;  %v1232_v58 = vpop.permute.xlu0 %1231 }
 0x213   :  { %v1222_v8 = vmax.f32 %v1156_v28, 0.0  ;;  %v1148_v57 = vadd.f32 %v2377_v36, %v1147_v52  ;;  %v1097_v28 = vadd.f32 %v2377_v36, %v2471_v56  ;;  %v1208_v52 = vmax.f32 %v1100_v49, 0.0 }
 0x214   :  { %v1209_v15 = vmax.f32 %v1105_v10, 0.0  ;;  %v1192_v62 = vmax.f32 %v1036_v53, 0.0 }
 0x215   :  { %1848 = vmatprep.subr.msk.mxu1 %vm773_vm1, %v1222_v8  ;;  %1847 = vmatmul.mubr.msk.f32.vlgmr.msra.gmra.mxu0 %vm773_vm1, %v2385_v42  ;;  %v1220_v43 = vmax.f32 %v1148_v57, 0.0  ;;  %v1207_v8 = vmax.f32 %v1097_v28, 0.0 }
 0x216   :  { %1849 = vmatpush3.xpose.msk.msra.mxu1 %vm773_vm1, %v1206_v12 }
 0x217   :  { %1850 = vmatprep.subr.msk.mxu1 %vm773_vm1, %v1221_v26 }
 0x21a   :  { %1851 = vmatpush3.xpose.msk.msra.mxu1 %vm773_vm1, %v1205_v48 }
 0x21b   :  { %1852 = vmatprep.subr.msk.mxu1 %vm773_vm1, %v1220_v43 }
 0x21e   :  { %1853 = vmatpush3.xpose.msk.msra.mxu1 %vm773_vm1, %v1204_v63 }
 0x21f   :  { %1854 = vmatprep.subr.msk.mxu1 %vm773_vm1, %v1219_v2 }
 0x222   :  { %1855 = vmatpush3.xpose.msk.msra.mxu1 %vm773_vm1, %v1203_v27 }
 0x223   :  { %1856 = vmatprep.subr.msk.mxu1 %vm773_vm1, %v1218_v37 }
 0x226   :  { %1857 = vmatpush3.xpose.msk.msra.mxu1 %vm773_vm1, %v1202_v19 }
 0x227   :  { %1858 = vmatprep.subr.msk.mxu1 %vm773_vm1, %v1217_v24 }
 0x22a   :  { %1859 = vmatpush3.xpose.msk.msra.mxu1 %vm773_vm1, %v1201_v38 }
 0x22b   :  { %1860 = vmatprep.subr.msk.mxu1 %vm773_vm1, %v1216_v9 }
 0x22e   :  { %1861 = vmatpush3.xpose.msk.msra.mxu1 %vm773_vm1, %v1200_v22 }
 0x22f   :  { %1862 = vmatprep.subr.msk.mxu1 %vm773_vm1, %v1215_v39 }
 0x232   :  { %1863 = vmatpush3.xpose.msk.msra.mxu1 %vm773_vm1, %v1199_v35 }
 0x233   :  { %1864 = vmatprep.subr.msk.mxu1 %vm773_vm1, %v1214_v7 }
 0x236   :  { %1865 = vmatpush3.xpose.msk.msra.mxu1 %vm773_vm1, %v1198_v6 }
 0x237   :  { %1866 = vmatprep.subr.msk.mxu1 %vm773_vm1, %v1213_v41 }
 0x23a   :  { %1867 = vmatpush3.xpose.msk.msra.mxu1 %vm773_vm1, %v1197_v4 }
 0x23b   :  { %1868 = vmatprep.subr.msk.mxu1 %vm773_vm1, %v1212_v44 }
 0x23e   :  { %1869 = vmatpush3.xpose.msk.msra.mxu1 %vm773_vm1, %v1196_v20 }
 0x23f   :  { %1870 = vmatprep.subr.msk.mxu1 %vm773_vm1, %v1211_v46 }
 0x242   :  { %1871 = vmatpush3.xpose.msk.msra.mxu1 %vm773_vm1, %v1195_v3 }
 0x243   :  { %1872 = vmatprep.subr.msk.mxu1 %vm773_vm1, %v1210_v23 }
 0x246   :  { %1873 = vmatpush3.xpose.msk.msra.mxu1 %vm773_vm1, %v1194_v59 }
 0x247   :  { %1874 = vmatprep.subr.msk.mxu1 %vm773_vm1, %v1209_v15 }
 0x24a   :  { %1875 = vmatpush3.xpose.msk.msra.mxu1 %vm773_vm1, %v1193_v55 }
 0x24b   :  { %1876 = vmatprep.subr.msk.mxu1 %vm773_vm1, %v1208_v52 }
 0x24e   :  { %1877 = vmatpush3.xpose.msk.msra.mxu1 %vm773_vm1, %v1192_v62 }
 0x24f   :  { %1878 = vmatprep.subr.msk.mxu1 %vm773_vm1, %v1207_v8 }
 0x252   :  { %1879 = vmatpush3.xpose.msk.msra.mxu1 %vm773_vm1, %v1191_v54 }
 0x255   :  { %1881 = vmatmul.mubr.msk.f32.vlgmr.msra.gmra.mxu1 %vm773_vm1, %v2385_v42 }
 0x2d5   :  { %v1495_v56 = vpop.f32.mrf.mxu0 }
 0x2d6   :  { %v1496_v12 = vadd.f32 %v1495_v56, %v1232_v58 }
 0x2d7   :  { %v1497_v26 = vpop.f32.mrf.mxu0 }
 0x2d8   :  { %1571 = vst [vmem:[%s2632_s7] sm:$0xff] %v1496_v12  ;;  %v1498_v36 = vadd.f32 %v1497_v26, %v1232_v58 }
 0x2da   :  { %1572 = vst [vmem:[%s2632_s7 + $0x8] sm:$0xff] %v1498_v36 }
 0x315   :  { %v1566_v50 = vpop.f32.mrf.mxu1 }
 0x316   :  { %v1567_v57 = vadd.f32 %v1566_v50, %v1232_v58 }
 0x317   :  { %v1568_v48 = vpop.f32.mrf.mxu1 }
 0x318   :  { %1573 = vst [vmem:[%s2632_s7 + $0x10] sm:$0xff] %v1567_v57  ;;  %v1569_v42 = vadd.f32 %v1568_v48, %v1232_v58 }
 0x31a   :  { %1574 = vst [vmem:[%s2632_s7 + $0x18] sm:$0xff] %v1569_v42 }

</bundles_post_ra>
